<compile_context>
chip_gen: v7x
topology: tpu7x:2x2x1
jax: 0.10.0
libtpu: 0.0.40
codegen_flags: <defaults>
</compile_context>

<pallas_src>
import functools
import math

import jax
import jax.numpy as jnp
from jax.experimental import pallas as pl
from jax.experimental.pallas import tpu as pltpu

_LANE = 128
_MIB = 1024 * 1024


def _round_up(x, m):
    return ((x + m - 1) // m) * m


def _round_down_rows(x, sub):
    """Largest multiple of `sub` (preferred) or 8 that is <= x; at least 8."""
    if x >= sub:
        return (x // sub) * sub
    if x >= 8:
        return (x // 8) * 8
    return 8


def _vmem_capacity_bytes():
    try:
        cap = int(pltpu.get_tpu_info().vmem_capacity_bytes)
        if cap > 0:
            return cap
    except Exception:
        pass
    return 64 * _MIB  # conservative (v7x per-TC VMEM)


# ----------------------------- kernels -------------------------------------


def _sq_err(pred_ref, tgt_ref, w_ref):
    """(w *) (pred - target)^2 in f32; w_ref may be None or broadcastable."""
    d = pred_ref[...].astype(jnp.float32) - tgt_ref[...].astype(jnp.float32)
    v = d * d
    if w_ref is not None:
        v = w_ref[...].astype(jnp.float32) * v
    return v


def _mean_step(pred_ref, tgt_ref, w_ref, out_ref, acc_ref, *,
               block_rows, rows_valid, need_mask, tiles_per_split):
    """Accumulate w*(pred-tgt)^2 into one (8, 128) vreg accumulator.

    Grid is (num_splits [parallel], tiles_per_split [arbitrary]); each split
    writes one (1, 1, 128) partial-sum row at its last step.
    """
    j = pl.program_id(1)

    @pl.when(j == 0)
    def _():
        acc_ref[...] = jnp.zeros(acc_ref.shape, acc_ref.dtype)

    v = _sq_err(pred_ref, tgt_ref, w_ref)            # (block_rows, 128) f32
    if need_mask:
        i = pl.program_id(0)
        start = (i * tiles_per_split + j) * block_rows
        row = start + jax.lax.broadcasted_iota(jnp.int32, (block_rows, 1), 0)
        v = jnp.where(row < rows_valid, v, 0.0)

    # Fold the whole tile into a single (8, 128) vreg: pure VALU adds, no XLU,
    # no large VMEM scratch read-modify-write per tile.
    acc_ref[...] += v.reshape(-1, 8, _LANE).sum(axis=0)

    @pl.when(j == pl.num_programs(1) - 1)
    def _():
        out_ref[...] = jnp.sum(acc_ref[...], axis=0,
                               keepdims=True).reshape(out_ref.shape)


def _mse_mean_kernel_nw(pred_ref, tgt_ref, out_ref, acc_ref, *,
                        block_rows, rows_valid, need_mask, tiles_per_split):
    _mean_step(pred_ref, tgt_ref, None, out_ref, acc_ref,
               block_rows=block_rows, rows_valid=rows_valid,
               need_mask=need_mask, tiles_per_split=tiles_per_split)


def _mse_mean_kernel_w(pred_ref, tgt_ref, w_ref, out_ref, acc_ref, *,
                       block_rows, rows_valid, need_mask, tiles_per_split):
    _mean_step(pred_ref, tgt_ref, w_ref, out_ref, acc_ref,
               block_rows=block_rows, rows_valid=rows_valid,
               need_mask=need_mask, tiles_per_split=tiles_per_split)


def _mse_none_kernel_nw(pred_ref, tgt_ref, out_ref):
    out_ref[...] = jnp.sum(_sq_err(pred_ref, tgt_ref, None),
                           axis=-1, keepdims=True)


def _mse_none_kernel_w(pred_ref, tgt_ref, w_ref, out_ref):
    out_ref[...] = jnp.sum(_sq_err(pred_ref, tgt_ref, w_ref),
                           axis=-1, keepdims=True)


# ----------------------------- wrapper --------------------------------------


def mse_loss(pred, target, weights=None, reduction="mean"):
    """Pallas-TPU equivalent of the PyTorch MSELoss module's forward."""
    assert reduction in ("none", "mean")
    pred = jnp.asarray(pred)
    target = jnp.asarray(target)
    assert pred.shape == target.shape

    lead_shape = pred.shape[:-1]
    D = pred.shape[-1]
    R = int(math.prod(lead_shape)) if lead_shape else 1

    # --- classify weights: stream full-shape weights; keep per-feature (D,)
    #     weights tiny and broadcast in-kernel; otherwise materialize. ---
    w_mode = "none"
    if weights is not None:
        weights = jnp.asarray(weights)
        if weights.shape == pred.shape:
            w_mode = "full"
        elif weights.ndim >= 1 and weights.shape[-1] == D and weights.size == D:
            w_mode = "feature"
        else:
            # TODO(synk): other broadcast patterns without materializing RxD.
            weights = jnp.broadcast_to(weights, pred.shape)
            w_mode = "full"

    dtypes = [pred.dtype, target.dtype]
    if weights is not None:
        dtypes.append(weights.dtype)
    out_dtype = functools.reduce(jnp.promote_types, dtypes)
    min_item = min(jnp.dtype(d).itemsize for d in dtypes)
    sub = max(8, 32 // max(1, min_item))       # packed-sublane row granularity

    vmem_cap = _vmem_capacity_bytes()
    budget = min(56 * _MIB, (vmem_cap * 3) // 4)   # total pipelined-buffer budget

    # ------------------------- reduction == 'none' -------------------------
    if reduction == "none":
        pred2 = pred.reshape(R, D)
        tgt2 = target.reshape(R, D)
        streams = [pred2, tgt2]
        if w_mode == "full":
            streams.append(weights.reshape(R, D))

        D_pad = _round_up(D, _LANE)            # lane-padded VMEM footprint
        sum_item = sum(x.dtype.itemsize for x in streams)
        # per tile-row: 2x input buffers (lane padded) + 2x lane-padded (tile,1)
        # f32 output buffers + margin for Mosaic f32 elementwise temporaries.
        per_row = 2 * D_pad * sum_item + 2 * _LANE * 4 + 2 * D_pad * 4
        t = max(sub, budget // per_row)
        t = min(t, 8192)                       # bound temporaries / compile size

        total_bytes = sum(x.size * x.dtype.itemsize for x in streams)
        want_split = (R >= 4 * sub) and (total_bytes > 4 * _MIB)
        if want_split:
            cap4 = _round_up(-(-R // 4), sub)  # >= 2 (target 4) grid entries
            tile = _round_down_rows(min(t, cap4), sub)
        elif t >= R:
            tile = R                           # single full block
        else:
            tile = _round_down_rows(t, sub)
        grid = (pl.cdiv(R, tile),)

        row_spec = pl.BlockSpec((tile, D), lambda i: (i, 0))
        in_specs = [row_spec] * len(streams)
        inputs = list(streams)
        if w_mode == "feature":
            inputs.append(weights.reshape(1, D))
            in_specs.append(pl.BlockSpec((1, D), lambda i: (0, 0)))
        kernel = _mse_none_kernel_nw if w_mode == "none" else _mse_none_kernel_w

        acct = tile * per_row + 2 * 8 * D_pad * 4 + _MIB
        vmem_limit = max(32 * _MIB, min(vmem_cap - 8 * _MIB, acct + 8 * _MIB))

        out = pl.pallas_call(
            kernel,
            out_shape=jax.ShapeDtypeStruct((R, 1), jnp.float32),
            grid_spec=pltpu.PrefetchScalarGridSpec(
                num_scalar_prefetch=0,
                grid=grid,
                in_specs=in_specs,
                out_specs=pl.BlockSpec((tile, 1), lambda i: (i, 0)),
            ),
            compiler_params=pltpu.CompilerParams(
                dimension_semantics=("parallel",),
                vmem_limit_bytes=int(vmem_limit),
            ),
        )(*inputs)
        # NOTE: (tile, 1) output is masked stores, but output bytes are <= 1/D
        # of the streamed input bytes; lane-dense small-D repack left as a
        # future v7x-only optimization for lowering robustness.
        return out[:, 0].reshape(lead_shape).astype(out_dtype)

    # ------------------------- reduction == 'mean' -------------------------
    # Row boundaries don't matter for the mean of per-row sums (= total / R),
    # so stream everything as lane-dense (rows, 128) full vregs.
    if w_mode == "feature" and _LANE % D != 0:
        # feature pattern does not tile a 128-lane row cleanly -> materialize.
        weights = jnp.broadcast_to(
            weights.reshape((1,) * len(lead_shape) + (D,)), pred.shape)
        w_mode = "full"

    N = R * D
    flat = [pred.reshape(-1), target.reshape(-1)]
    if w_mode == "full":
        flat.append(weights.reshape(-1))

    n_pad = _round_up(max(N, _LANE * 8), _LANE)   # >= 8 rows, multiple of 128
    if n_pad != N:
        # zero padding: pred == target there, so it contributes exactly 0.
        flat = [jnp.pad(x, (0, n_pad - N)) for x in flat]
    rows = n_pad // _LANE
    flat = [x.reshape(rows, _LANE) for x in flat]

    sum_item = sum(x.dtype.itemsize for x in flat)
    # per row: 2x input buffers + margin for f32 elementwise temporaries.
    per_row = 2 * _LANE * sum_item + 2 * _LANE * 4
    br = max(8, budget // per_row)
    br = min(br, 8192)
    max_br = (rows // 8) * 8                   # keep block <= array (mult of 8)

    total_bytes = sum(x.size * x.dtype.itemsize for x in flat)
    want_split = (rows >= 2 * sub) and (total_bytes > 4 * _MIB)
    if want_split:
        br = min(br, _round_up(-(-rows // 4), 8))   # >= ~4 tiles total
    block_rows = _round_down_rows(min(br, max_br), sub)

    tiles_total = pl.cdiv(rows, block_rows)
    # Two independent halves so v7x's two TensorCores each stream half the
    # data; on 1-TC chips this is just a 2-long serial loop over splits.
    num_splits = 2 if tiles_total >= 2 else 1
    tiles_per_split = pl.cdiv(tiles_total, num_splits)
    need_mask = (num_splits * tiles_per_split * block_rows) > rows

    if need_mask:
        last_tile = tiles_total - 1

        def data_map(i, j):
            # Clamp so no block index ever points fully past the array; the
            # phantom / overhang rows are zeroed by the in-kernel row mask.
            return (jnp.minimum(i * tiles_per_split + j, last_tile), 0)
    else:
        def data_map(i, j):
            return (i * tiles_per_split + j, 0)

    data_spec = pl.BlockSpec((block_rows, _LANE), data_map)
    inputs = list(flat)
    in_specs = [data_spec] * len(flat)
    if w_mode == "feature":
        # one 128-lane row holding the per-feature weights tiled 128/D times.
        w_row = jnp.tile(weights.reshape(D), _LANE // D).reshape(1, _LANE)
        inputs.append(w_row)
        in_specs.append(pl.BlockSpec((1, _LANE), lambda i, j: (0, 0)))

    kern = _mse_mean_kernel_nw if w_mode == "none" else _mse_mean_kernel_w
    kern = functools.partial(kern, block_rows=int(block_rows),
                             rows_valid=int(rows),
                             need_mask=bool(need_mask),
                             tiles_per_split=int(tiles_per_split))

    acct = (sum(2 * block_rows * _LANE * x.dtype.itemsize for x in flat)
            + 2 * block_rows * _LANE * 4       # temporaries margin (f32)
            + 8 * _LANE * 4                    # (8, 128) accumulator
            + 4 * 8 * _LANE * 4                # out / feature-row buffers
            + _MIB)
    vmem_limit = max(32 * _MIB, min(vmem_cap - 8 * _MIB, acct + 8 * _MIB))

    partials = pl.pallas_call(
        kern,
        out_shape=jax.ShapeDtypeStruct((num_splits, 1, _LANE), jnp.float32),
        grid_spec=pltpu.PrefetchScalarGridSpec(
            num_scalar_prefetch=0,
            grid=(num_splits, tiles_per_split),
            in_specs=in_specs,
            out_specs=pl.BlockSpec((1, 1, _LANE), lambda i, j: (i, 0, 0)),
            scratch_shapes=[pltpu.VMEM((8, _LANE), jnp.float32)],
        ),
        compiler_params=pltpu.CompilerParams(
            dimension_semantics=("parallel", "arbitrary"),
            vmem_limit_bytes=int(vmem_limit),
        ),
    )(*inputs)
    # mean over the per-row sums == total / number-of-rows (matches the spec).
    return (jnp.sum(partials) / jnp.float32(R)).astype(out_dtype)


# ----------------------------- reference ------------------------------------


def mse_loss_ref(pred, target, weights=None, reduction="mean"):
    if weights is not None:
        loss = jnp.sum(weights * (pred - target) ** 2, axis=-1)
    else:
        loss = jnp.sum((pred - target) ** 2, axis=-1)
    if reduction == "mean":
        return jnp.mean(loss)
    return loss


# ----------------------------- main ------------------------------------------

if __name__ == "__main__":
    key = jax.random.PRNGKey(0)

    def run_suite(shape):
        k1, k2, k3, k4 = jax.random.split(jax.random.fold_in(key, shape[-1]), 4)
        pred = jax.random.normal(k1, shape, dtype=jnp.float32)
        target = jax.random.normal(k2, shape, dtype=jnp.float32)
        w_full = jax.random.uniform(k3, shape, dtype=jnp.float32)
        w_feat = jax.random.uniform(k4, (shape[-1],), dtype=jnp.float32)
        for reduction in ("mean", "none"):
            for w in (None, w_full, w_feat):
                got = jax.block_until_ready(mse_loss(pred, target, w, reduction))
                want = mse_loss_ref(pred, target, w, reduction)
                assert got.shape == want.shape, (shape, reduction, got.shape,
                                                 want.shape)
                assert jnp.allclose(got, want, rtol=1e-4, atol=1e-4), (
                    shape, reduction, got, want)

    run_suite((2, 8, 32))    # tiny: single-block paths
    run_suite((3, 35, 24))   # ragged: lane padding, 2-way split, masked tail

    print("KERNEL_OK")
</pallas_src>

<mosaic_0001>
module attributes {stable_mosaic.version = 11 : i64} {
  func.func @_mse_mean_kernel_nw(%arg0: i32, %arg1: i32, %arg2: memref<8x128xf32, #tpu.memory_space<vmem>>, %arg3: memref<8x128xf32, #tpu.memory_space<vmem>>, %arg4: memref<1x1x128xf32, #tpu.memory_space<vmem>>, %arg5: memref<8x128xf32, #tpu.memory_space<vmem>>) attributes {dimension_semantics = [#tpu.dimension_semantics<parallel>, #tpu.dimension_semantics<arbitrary>], iteration_bounds = array<i64: 1, 1>, scalar_prefetch = 0 : i64, scratch_operands = 1 : i64, tpu.core_type = #tpu.core_type<tc>, window_params = [{transform_indices = @transform_0, window_bounds = array<i64: 8, 128>}, {transform_indices = @transform_1, window_bounds = array<i64: 8, 128>}, {transform_indices = @transform_2, window_bounds = array<i64: 1, 1, 128>}]} {
    %c0_i32 = arith.constant 0 : i32
    %0 = arith.cmpi eq, %arg1, %c0_i32 : i32
    %1 = arith.extui %0 : i1 to i32
    %c0_i32_0 = arith.constant 0 : i32
    %2 = arith.cmpi ne, %1, %c0_i32_0 : i32
    scf.if %2 {
      %cst_10 = arith.constant 0.000000e+00 : f32
      %15 = vector.broadcast %cst_10 : f32 to vector<8x128xf32>
      %c0_11 = arith.constant 0 : index
      %c0_12 = arith.constant 0 : index
      %16 = vector.load %arg5[%c0_11, %c0_12] : memref<8x128xf32, #tpu.memory_space<vmem>>, vector<8x128xf32>
      tpu.vector_store %arg5[%c0_11, %c0_12], %15 {strides = array<i32>} : memref<8x128xf32, #tpu.memory_space<vmem>>, vector<8x128xf32>,
    } else {
    }
    %c0 = arith.constant 0 : index
    %c0_1 = arith.constant 0 : index
    %3 = vector.load %arg2[%c0, %c0_1] : memref<8x128xf32, #tpu.memory_space<vmem>>, vector<8x128xf32>
    %c0_2 = arith.constant 0 : index
    %c0_3 = arith.constant 0 : index
    %4 = vector.load %arg3[%c0_2, %c0_3] : memref<8x128xf32, #tpu.memory_space<vmem>>, vector<8x128xf32>
    %5 = arith.subf %3, %4 : vector<8x128xf32>
    %6 = arith.mulf %5, %5 : vector<8x128xf32>
    %c0_4 = arith.constant 0 : index
    %c0_5 = arith.constant 0 : index
    %7 = vector.load %arg5[%c0_4, %c0_5] : memref<8x128xf32, #tpu.memory_space<vmem>>, vector<8x128xf32>
    %8 = vector.shape_cast %6 : vector<8x128xf32> to vector<1x8x128xf32>
    %cst = arith.constant dense<0.000000e+00> : vector<8x128xf32>
    %9 = vector.multi_reduction <add>, %8, %cst [0] : vector<1x8x128xf32> to vector<8x128xf32>
    %10 = arith.addf %7, %9 : vector<8x128xf32>
    %c0_6 = arith.constant 0 : index
    %c0_7 = arith.constant 0 : index
    %11 = vector.load %arg5[%c0_6, %c0_7] : memref<8x128xf32, #tpu.memory_space<vmem>>, vector<8x128xf32>
    tpu.vector_store %arg5[%c0_6, %c0_7], %10 {strides = array<i32>} : memref<8x128xf32, #tpu.memory_space<vmem>>, vector<8x128xf32>,
    %c0_i32_8 = arith.constant 0 : i32
    %12 = arith.cmpi eq, %arg1, %c0_i32_8 : i32
    %13 = arith.extui %12 : i1 to i32
    %c0_i32_9 = arith.constant 0 : i32
    %14 = arith.cmpi ne, %13, %c0_i32_9 : i32
    scf.if %14 {
      %c0_10 = arith.constant 0 : index
      %c0_11 = arith.constant 0 : index
      %15 = vector.load %arg5[%c0_10, %c0_11] : memref<8x128xf32, #tpu.memory_space<vmem>>, vector<8x128xf32>
      %cst_12 = arith.constant dense<0.000000e+00> : vector<128xf32>
      %16 = vector.multi_reduction <add>, %15, %cst_12 [0] : vector<8x128xf32> to vector<128xf32>
      %17 = vector.shape_cast %16 : vector<128xf32> to vector<1x128xf32>
      %18 = vector.shape_cast %17 : vector<1x128xf32> to vector<1x1x128xf32>
      %c0_13 = arith.constant 0 : index
      %c0_14 = arith.constant 0 : index
      %c0_15 = arith.constant 0 : index
      %19 = vector.load %arg4[%c0_13, %c0_14, %c0_15] : memref<1x1x128xf32, #tpu.memory_space<vmem>>, vector<1x1x128xf32>
      tpu.vector_store %arg4[%c0_13, %c0_14, %c0_15], %18 {strides = array<i32>} : memref<1x1x128xf32, #tpu.memory_space<vmem>>, vector<1x1x128xf32>,
    } else {
    }
    return
  }
  func.func @transform_0(%arg0: i32, %arg1: i32) -> (i32, i32) {
    %c1_i32 = arith.constant 1 : i32
    %0 = arith.muli %arg0, %c1_i32 : i32
    %1 = arith.addi %0, %arg1 : i32
    %c0_i32 = arith.constant 0 : i32
    %c0_i32_0 = arith.constant 0 : i32
    return %1, %c0_i32 : i32, i32
  }
  func.func @transform_1(%arg0: i32, %arg1: i32) -> (i32, i32) {
    %c1_i32 = arith.constant 1 : i32
    %0 = arith.muli %arg0, %c1_i32 : i32
    %1 = arith.addi %0, %arg1 : i32
    %c0_i32 = arith.constant 0 : i32
    %c0_i32_0 = arith.constant 0 : i32
    return %1, %c0_i32 : i32, i32
  }
  func.func @transform_2(%arg0: i32, %arg1: i32) -> (i32, i32, i32) {
    %c0_i32 = arith.constant 0 : i32
    %c0_i32_0 = arith.constant 0 : i32
    %c0_i32_1 = arith.constant 0 : i32
    return %arg0, %c0_i32, %c0_i32_0 : i32, i32, i32
  }
}

</mosaic_0001>

<bundles_post_ra>
// kernel: tpu_custom_call.1
= control target key start
LH: loop header
LB: loop body
LE: loop exit
PB: predicated region body
PF: predicated region fallthrough
CT: control target
= control target key end

     0   :  { %7 = vsyncpa [#allocation4], 0  ;;  %s213_s0 = inlined_call_operand.hbm [shape: f32[8,128], index: 0, kind: input, shape index: {}]   ;;  %s214_s1 = inlined_call_operand.hbm [shape: f32[8,128], index: 1, kind: input, shape index: {}]   ;;  %s215_s2 = inlined_call_operand.hbm [shape: f32[1,1,128], index: 2, kind: output, shape index: {}]  }
   0x1   :  { %8 = vsyncpa [#allocation7], 0 }
   0x2   :  { %9 = vsyncpa [#allocation5], 0  ;;  %s159_s9 = smov [#allocation3]   ;;  %s160_s11 = smov [#allocation6]  }
   0x3   :  { %s19_s10 = sshll.u32 %s159_s9, 4  ;;  %s32_s12 = sshll.u32 %s160_s11, 4  ;;  %s20_s10 = int_to_ptr.vmem [resolvable:$true] %s19_s10  ;;  %s33_s12 = int_to_ptr.vmem [resolvable:$true] %s32_s12 }
   0x4   :  { %s87_s15 = scalar_lea.hbm %s213_s0, 128 }
   0x5   :  { %p88_p0 = scmp.ne.s32.totalorder %s213_s0, %s87_s15  ;;  %p91_p1 = scmp.lt.u32.totalorder %s87_s15, %s213_s0 }
   0x7   :  { %p93_p2 = pnand %p91_p1, %p88_p0 }
   0x9   :  { %96 = shalt.err (!%p93_p2)
}
   0xa   :  { %s97_s20 = scalar_lea.vmem %s20_s10, 128  ;;  %p102_p4 = scmp.lt.s32.totalorder %s20_s10, %s20_s10 }
   0xb   :  { %p98_p3 = scmp.ne.s32.totalorder %s20_s10, %s97_s20  ;;  %p103_p5 = scmp.lt.s32.totalorder %s97_s20, %s97_s20 }
   0xd   :  { %p104_p6 = por %p103_p5, %p102_p4 }
   0xf   :  { %p105_p7 = pnand %p104_p6, %p98_p3 }
  0x11   :  { %108 = shalt.err (!%p105_p7)
}
  0x12   :  { %22 = dma.hbm_to_vmem [thread:$0]  %s213_s0, 128, %s20_s10, [#allocation4]  }
  0x13   :  { %s109_s25 = scalar_lea.hbm %s214_s1, 128 }
  0x14   :  { %p110_p8 = scmp.ne.s32.totalorder %s214_s1, %s109_s25  ;;  %p113_p9 = scmp.lt.u32.totalorder %s109_s25, %s214_s1 }
  0x16   :  { %p115_p10 = pnand %p113_p9, %p110_p8 }
  0x18   :  { %118 = shalt.err (!%p115_p10)
}
  0x19   :  { %s119_s30 = scalar_lea.vmem %s33_s12, 128  ;;  %p124_p12 = scmp.lt.s32.totalorder %s33_s12, %s33_s12 }
  0x1a   :  { %p120_p11 = scmp.ne.s32.totalorder %s33_s12, %s119_s30  ;;  %p125_p13 = scmp.lt.s32.totalorder %s119_s30, %s119_s30 }
  0x1c   :  { %p126_p0 = por %p125_p13, %p124_p12 }
  0x1e   :  { %p127_p1 = pnand %p126_p0, %p120_p11 }
  0x20   :  { %130 = shalt.err (!%p127_p1)
}
  0x21   :  { %35 = dma.hbm_to_vmem [thread:$0]  %s214_s1, 128, %s33_s12, [#allocation7]  }
  0x22   :  { %153 = dma.done.wait [#allocation4], 128  }
  0x23   :  { %154 = vsyncadd [#allocation4], 4294967168 }
  0x24   :  { %155 = dma.done.wait [#allocation7], 128  }
  0x25   :  { %156 = vsyncadd [#allocation7], 4294967168  ;;  %v49_v0 = vld [vmem:[#allocation3] sm:$0xff]  ;;  %v50_v1 = vld [vmem:[#allocation6] sm:$0xff]  ;;  %s161_s4 = smov [#allocation8]  }
  0x26   :  { %v51_v2 = vsub.f32 %v49_v0, %v50_v1  ;;  %s74_s5 = sshll.u32 %s161_s4, 4  ;;  %s75_s5 = int_to_ptr.vmem [resolvable:$true] %s74_s5 }
  0x27   :  { %s131_s6 = scalar_lea.vmem %s75_s5, 16  ;;  %s135_s1 = scalar_lea.vmem %s75_s5, 32 }
  0x28   :  { %v52_v3 = vmul.f32 %v51_v2, %v51_v2  ;;  %p132_p2 = scmp.ne.s32.totalorder %s75_s5, %s131_s6  ;;  %p136_p3 = scmp.lt.s32.totalorder %s75_s5, %s75_s5 }
  0x29   :  { %p137_p4 = scmp.lt.s32.totalorder %s135_s1, %s131_s6 }
  0x2a   :  { %v61_v4 = vrot.slane %v52_v3, 4 }
  0x2b   :  { %p138_p5 = por %p137_p4, %p136_p3 }
  0x2c   :  { %v62_v5 = vadd.f32 %v61_v4, %v52_v3 }
  0x2d   :  { %p139_p6 = pnand %p138_p5, %p132_p2 }
  0x2e   :  { %v63_v6 = vrot.slane %v62_v5, 2 }
  0x30   :  { %v64_v7 = vadd.f32 %v63_v6, %v62_v5 }
  0x32   :  { %v65_v8 = vrot.slane %v64_v7, 1 }
  0x34   :  { %v66_v9 = vadd.f32 %v65_v8, %v64_v7 }
  0x36   :  { %67 = vst [vmem:[#allocation8] sm:$0x1] %v66_v9 }
  0x37   :  { %142 = shalt.err (!%p139_p6)
}
  0x38   :  { %s143_s9 = scalar_lea.hbm %s215_s2, 16 }
  0x39   :  { %p144_p7 = scmp.ne.s32.totalorder %s215_s2, %s143_s9  ;;  %p147_p8 = scmp.lt.u32.totalorder %s143_s9, %s215_s2 }
  0x3b   :  { %p149_p9 = pnand %p147_p8, %p144_p7 }
  0x3d   :  { %152 = shalt.err (!%p149_p9)
}
  0x3e   :  { %77 = dma.vmem_to_hbm [thread:$0]  %s75_s5, 16, %s215_s2, [#allocation5]  }
  0x3f   :  { %157 = dma.done.wait [#allocation5], 16  }
  0x40   :  { %158 = vsyncadd [#allocation5], 4294967280 }
  0x41   :  { %81 = vsyncpa [#allocation4], 1 }
  0x42   :  { %82 = vsyncpa [#allocation7], 1 }
  0x43   :  { %83 = vsyncpa [#allocation5], 1 }

</bundles_post_ra>
